<compile_context>
chip_gen: v6e
topology: v6e:2x2x1
jax: 0.10.0
libtpu: 0.0.40
codegen_flags: <defaults>
</compile_context>

<pallas_src>
import jax
import jax.numpy as jnp
from jax import lax
from jax.experimental import pallas as pl
from jax.experimental.pallas import tpu as pltpu


def _hybrid_kernel(uid_ref, iid_ref, cf_ref,          # batch-tiled VMEM inputs
                   uemb_ref, iemb_ref,                 # resident tables (VMEM)
                   w1u_ref, w1c_ref, b1_ref, w2r_ref,  # resident weights (VMEM)
                   b2h_ref,                            # SMEM scalar: 0.5 * b2
                   out_ref):                           # (tb, 1) output block
    tb = uid_ref.shape[0]
    U = uemb_ref.shape[0]
    I = iemb_ref.shape[0]

    uid = uid_ref[...]                                  # (tb, 1) int32
    iid = iid_ref[...]                                  # (tb, 1) int32

    # --- one-hot MXU gather (tables are tiny; ids outside [0, U) give an
    #     all-zero one-hot row, so there is no OOB-read hazard) ---
    onehot_u = (lax.broadcasted_iota(jnp.int32, (tb, U), 1) == uid
                ).astype(jnp.float32)                   # (tb, U)
    onehot_i = (lax.broadcasted_iota(jnp.int32, (tb, I), 1) == iid
                ).astype(jnp.float32)                   # (tb, I)
    ue = jnp.dot(onehot_u, uemb_ref[...],
                 preferred_element_type=jnp.float32)    # (tb, L)
    ie = jnp.dot(onehot_i, iemb_ref[...],
                 preferred_element_type=jnp.float32)    # (tb, L)

    # --- layer 1 on the MXU: concat([ue, cf]) @ W1 == ue@W1_u + cf@W1_c ---
    cf = cf_ref[...]                                    # (tb, C) f32
    h = (jnp.dot(ue, w1u_ref[...], preferred_element_type=jnp.float32)
         + jnp.dot(cf, w1c_ref[...], preferred_element_type=jnp.float32)
         + b1_ref[...])                                 # (tb, L)
    h = jnp.maximum(h, 0.0)                             # ReLU
    # Dropout(0.5) is identity at inference time (PyTorch eval semantics).

    # --- MF term + degenerate (L,1) second matmul fused into one VPU mul +
    #     a single cross-lane reduce; (tb,1) output avoids any lane relayout.
    fused = ue * ie + h * w2r_ref[...]                  # (tb, L)
    red = jnp.sum(fused, axis=1, keepdims=True)         # (tb, 1)
    out_ref[...] = red * 0.5 + b2h_ref[0]               # (mf + mlp) / 2


def hybrid_recommender_forward(user_ids, item_ids, content_features, params):
    """JAX/Pallas equivalent of HybridRecommender.forward (content path, eval)."""
    user_emb = params["user_emb"].astype(jnp.float32)   # (U, L)
    item_emb = params["item_emb"].astype(jnp.float32)   # (I, L)
    U, L = user_emb.shape
    B = int(user_ids.shape[0])
    C = int(content_features.shape[1])

    # --- wrapper-side layout plumbing (no extra compute, no cf lane pad) ---
    w1 = params["w1"].astype(jnp.float32)               # (L + C, L)
    w1u = w1[:L, :]                                     # acts on ue
    w1c = w1[L:, :]                                     # acts on content feats
    b1 = params["b1"].reshape(1, L).astype(jnp.float32)
    w2_row = params["w2"].reshape(1, L).astype(jnp.float32)     # (L,1) -> (1,L)
    b2_half = (0.5 * params["b2"]).reshape(1).astype(jnp.float32)  # SMEM scalar

    # --- batch tiling: >= 2 grid steps once B is big enough so the
    #     "parallel" batch axis shards across v7x's two TensorCores ---
    def round_up(x, m):
        return -(-x // m) * m

    if B <= 16:
        tb = round_up(B, 8)
    else:
        tb = min(512, round_up(pl.cdiv(B, 2), 8))
    b_pad = round_up(B, tb)

    uid = user_ids.astype(jnp.int32).reshape(B, 1)
    iid = item_ids.astype(jnp.int32).reshape(B, 1)
    cf = content_features.astype(jnp.float32)           # (B, C), unpadded lanes
    if b_pad != B:
        # Padded rows get id -1 -> all-zero one-hot -> harmless, sliced off.
        uid = jnp.pad(uid, ((0, b_pad - B), (0, 0)), constant_values=-1)
        iid = jnp.pad(iid, ((0, b_pad - B), (0, 0)), constant_values=-1)
        cf = jnp.pad(cf, ((0, b_pad - B), (0, 0)))

    grid = (b_pad // tb,)
    const = lambda shape: pl.BlockSpec(shape, lambda i: (0,) * len(shape))

    out = pl.pallas_call(
        _hybrid_kernel,
        out_shape=jax.ShapeDtypeStruct((b_pad, 1), jnp.float32),
        grid=grid,
        in_specs=[
            pl.BlockSpec((tb, 1), lambda i: (i, 0)),     # user ids (VMEM)
            pl.BlockSpec((tb, 1), lambda i: (i, 0)),     # item ids (VMEM)
            pl.BlockSpec((tb, C), lambda i: (i, 0)),     # content features
            const(user_emb.shape),                       # user table, resident
            const(item_emb.shape),                       # item table, resident
            const(w1u.shape),
            const(w1c.shape),
            const(b1.shape),
            const(w2_row.shape),
            pl.BlockSpec(memory_space=pltpu.MemorySpace.SMEM),   # 0.5*b2 scalar
        ],
        out_specs=pl.BlockSpec((tb, 1), lambda i: (i, 0)),
        compiler_params=pltpu.CompilerParams(
            dimension_semantics=("parallel",),
            # Explicit budget; re-check if content_dim / tables grow (v5e
            # default scoped VMEM is 16 MiB, v7x physical per-TC is 64 MiB).
            vmem_limit_bytes=32 * 1024 * 1024,
        ),
    )(uid, iid, cf, user_emb, item_emb, w1u, w1c, b1, w2_row, b2_half)

    return out[:B]                                       # (B, 1)


def init_params(key, num_users, num_items, latent_dim, content_dim):
    """Deterministic synthetic parameter init (shapes match the nn.Module)."""
    k = jax.random.split(key, 6)
    in1 = latent_dim + content_dim
    bound1 = 1.0 / jnp.sqrt(in1)
    bound2 = 1.0 / jnp.sqrt(latent_dim)
    return {
        "user_emb": jax.random.normal(k[0], (num_users, latent_dim), jnp.float32),
        "item_emb": jax.random.normal(k[1], (num_items, latent_dim), jnp.float32),
        "w1": jax.random.uniform(k[2], (in1, latent_dim), jnp.float32,
                                 -bound1, bound1),
        "b1": jax.random.uniform(k[3], (latent_dim,), jnp.float32,
                                 -bound1, bound1),
        "w2": jax.random.uniform(k[4], (latent_dim, 1), jnp.float32,
                                 -bound2, bound2),
        "b2": jax.random.uniform(k[5], (1,), jnp.float32, -bound2, bound2),
    }


def reference_forward(user_ids, item_ids, content_features, params):
    """Pure-JAX reference mirroring the PyTorch forward (eval mode)."""
    ue = jnp.take(params["user_emb"], user_ids, axis=0)
    ie = jnp.take(params["item_emb"], item_ids, axis=0)
    mf = jnp.sum(ue * ie, axis=1, keepdims=True)
    x = jnp.concatenate([ue, content_features], axis=1)
    h = jnp.maximum(x @ params["w1"] + params["b1"], 0.0)
    mlp = h @ params["w2"] + params["b2"]
    return (mf + mlp) / 2.0


if __name__ == "__main__":
    num_users, num_items = 50, 40
    latent_dim, content_dim = 32, 100
    batch = 8

    key = jax.random.PRNGKey(0)
    kp, ku, ki, kc = jax.random.split(key, 4)

    params = init_params(kp, num_users, num_items, latent_dim, content_dim)
    user_ids = jax.random.randint(ku, (batch,), 0, num_users, dtype=jnp.int32)
    item_ids = jax.random.randint(ki, (batch,), 0, num_items, dtype=jnp.int32)
    content_features = jax.random.normal(kc, (batch, content_dim), jnp.float32)

    out = hybrid_recommender_forward(user_ids, item_ids, content_features, params)
    out = jax.block_until_ready(out)

    ref = reference_forward(user_ids, item_ids, content_features, params)
    assert out.shape == (batch, 1)
    assert jnp.allclose(out, ref, atol=1e-4, rtol=1e-4)

    print("KERNEL_OK")
</pallas_src>

<mosaic_0001>
module attributes {stable_mosaic.version = 11 : i64} {
  func.func @_hybrid_kernel(%arg0: i32, %arg1: memref<8x1xi32, #tpu.memory_space<vmem>>, %arg2: memref<8x1xi32, #tpu.memory_space<vmem>>, %arg3: memref<8x100xf32, #tpu.memory_space<vmem>>, %arg4: memref<50x32xf32, #tpu.memory_space<vmem>>, %arg5: memref<40x32xf32, #tpu.memory_space<vmem>>, %arg6: memref<32x32xf32, #tpu.memory_space<vmem>>, %arg7: memref<100x32xf32, #tpu.memory_space<vmem>>, %arg8: memref<1x32xf32, #tpu.memory_space<vmem>>, %arg9: memref<1x32xf32, #tpu.memory_space<vmem>>, %arg10: memref<1xf32, #tpu.memory_space<smem>>, %arg11: memref<8x1xf32, #tpu.memory_space<vmem>>) attributes {dimension_semantics = [#tpu.dimension_semantics<parallel>], iteration_bounds = array<i64: 1>, scalar_prefetch = 0 : i64, scratch_operands = 0 : i64, tpu.core_type = #tpu.core_type<tc>, window_params = [{transform_indices = @transform_0, window_bounds = array<i64: 8, 1>}, {transform_indices = @transform_1, window_bounds = array<i64: 8, 1>}, {transform_indices = @transform_2, window_bounds = array<i64: 8, 100>}, {pipeline_mode = #tpu.pipeline_mode<synchronous>, transform_indices = @transform_3, window_bounds = array<i64: 50, 32>}, {pipeline_mode = #tpu.pipeline_mode<synchronous>, transform_indices = @transform_4, window_bounds = array<i64: 40, 32>}, {pipeline_mode = #tpu.pipeline_mode<synchronous>, transform_indices = @transform_5, window_bounds = array<i64: 32, 32>}, {pipeline_mode = #tpu.pipeline_mode<synchronous>, transform_indices = @transform_6, window_bounds = array<i64: 100, 32>}, {pipeline_mode = #tpu.pipeline_mode<synchronous>, transform_indices = @transform_7, window_bounds = array<i64: 1, 32>}, {pipeline_mode = #tpu.pipeline_mode<synchronous>, transform_indices = @transform_8, window_bounds = array<i64: 1, 32>}, {transform_indices = @transform_9, window_bounds = array<i64: 1>}, {transform_indices = @transform_10, window_bounds = array<i64: 8, 1>}]} {
    %c0 = arith.constant 0 : index
    %c0_0 = arith.constant 0 : index
    %0 = vector.load %arg1[%c0, %c0_0] : memref<8x1xi32, #tpu.memory_space<vmem>>, vector<8x1xi32>
    %c0_1 = arith.constant 0 : index
    %c0_2 = arith.constant 0 : index
    %1 = vector.load %arg2[%c0_1, %c0_2] : memref<8x1xi32, #tpu.memory_space<vmem>>, vector<8x1xi32>
    %2 = tpu.iota {dimensions = array<i32: 1>} : vector<8x50xi32>
    %3 = vector.broadcast %0 : vector<8x1xi32> to vector<8x50xi32>
    %4 = arith.cmpi eq, %2, %3 : vector<8x50xi32>
    %5 = arith.extui %4 : vector<8x50xi1> to vector<8x50xi32>
    %6 = arith.sitofp %5 : vector<8x50xi32> to vector<8x50xf32>
    %7 = tpu.iota {dimensions = array<i32: 1>} : vector<8x40xi32>
    %8 = vector.broadcast %1 : vector<8x1xi32> to vector<8x40xi32>
    %9 = arith.cmpi eq, %7, %8 : vector<8x40xi32>
    %10 = arith.extui %9 : vector<8x40xi1> to vector<8x40xi32>
    %11 = arith.sitofp %10 : vector<8x40xi32> to vector<8x40xf32>
    %c0_3 = arith.constant 0 : index
    %c0_4 = arith.constant 0 : index
    %12 = vector.load %arg4[%c0_3, %c0_4] : memref<50x32xf32, #tpu.memory_space<vmem>>, vector<50x32xf32>
    %cst = arith.constant dense<0.000000e+00> : vector<8x32xf32>
    %13 = tpu.matmul %6, %12, %cst {dimension_numbers = #tpu.dot_dimension_numbers<[1], [0], [0], [1], [0, 0, 1, 1], [], []>} : vector<8x50xf32>, vector<50x32xf32>, vector<8x32xf32> -> vector<8x32xf32>
    %c0_5 = arith.constant 0 : index
    %c0_6 = arith.constant 0 : index
    %14 = vector.load %arg5[%c0_5, %c0_6] : memref<40x32xf32, #tpu.memory_space<vmem>>, vector<40x32xf32>
    %cst_7 = arith.constant dense<0.000000e+00> : vector<8x32xf32>
    %15 = tpu.matmul %11, %14, %cst_7 {dimension_numbers = #tpu.dot_dimension_numbers<[1], [0], [0], [1], [0, 0, 1, 1], [], []>} : vector<8x40xf32>, vector<40x32xf32>, vector<8x32xf32> -> vector<8x32xf32>
    %c0_8 = arith.constant 0 : index
    %c0_9 = arith.constant 0 : index
    %16 = vector.load %arg3[%c0_8, %c0_9] : memref<8x100xf32, #tpu.memory_space<vmem>>, vector<8x100xf32>
    %c0_10 = arith.constant 0 : index
    %c0_11 = arith.constant 0 : index
    %17 = vector.load %arg6[%c0_10, %c0_11] : memref<32x32xf32, #tpu.memory_space<vmem>>, vector<32x32xf32>
    %cst_12 = arith.constant dense<0.000000e+00> : vector<8x32xf32>
    %18 = tpu.matmul %13, %17, %cst_12 {dimension_numbers = #tpu.dot_dimension_numbers<[1], [0], [0], [1], [0, 0, 1, 1], [], []>} : vector<8x32xf32>, vector<32x32xf32>, vector<8x32xf32> -> vector<8x32xf32>
    %c0_13 = arith.constant 0 : index
    %c0_14 = arith.constant 0 : index
    %19 = vector.load %arg7[%c0_13, %c0_14] : memref<100x32xf32, #tpu.memory_space<vmem>>, vector<100x32xf32>
    %cst_15 = arith.constant dense<0.000000e+00> : vector<8x32xf32>
    %20 = tpu.matmul %16, %19, %cst_15 {dimension_numbers = #tpu.dot_dimension_numbers<[1], [0], [0], [1], [0, 0, 1, 1], [], []>} : vector<8x100xf32>, vector<100x32xf32>, vector<8x32xf32> -> vector<8x32xf32>
    %21 = arith.addf %18, %20 : vector<8x32xf32>
    %c0_16 = arith.constant 0 : index
    %c0_17 = arith.constant 0 : index
    %22 = vector.load %arg8[%c0_16, %c0_17] : memref<1x32xf32, #tpu.memory_space<vmem>>, vector<1x32xf32>
    %23 = vector.broadcast %22 : vector<1x32xf32> to vector<8x32xf32>
    %24 = arith.addf %21, %23 : vector<8x32xf32>
    %cst_18 = arith.constant 0.000000e+00 : f32
    %25 = vector.broadcast %cst_18 : f32 to vector<8x32xf32>
    %26 = arith.maximumf %24, %25 : vector<8x32xf32>
    %27 = arith.mulf %13, %15 : vector<8x32xf32>
    %c0_19 = arith.constant 0 : index
    %c0_20 = arith.constant 0 : index
    %28 = vector.load %arg9[%c0_19, %c0_20] : memref<1x32xf32, #tpu.memory_space<vmem>>, vector<1x32xf32>
    %29 = vector.broadcast %28 : vector<1x32xf32> to vector<8x32xf32>
    %30 = arith.mulf %26, %29 : vector<8x32xf32>
    %31 = arith.addf %27, %30 : vector<8x32xf32>
    %cst_21 = arith.constant dense<0.000000e+00> : vector<8xf32>
    %32 = vector.multi_reduction <add>, %31, %cst_21 [1] : vector<8x32xf32> to vector<8xf32>
    %33 = vector.shape_cast %32 : vector<8xf32> to vector<8x1xf32>
    %cst_22 = arith.constant 5.000000e-01 : f32
    %34 = vector.broadcast %cst_22 : f32 to vector<8x1xf32>
    %35 = arith.mulf %33, %34 : vector<8x1xf32>
    %c0_23 = arith.constant 0 : index
    %36 = memref.load %arg10[%c0_23] : memref<1xf32, #tpu.memory_space<smem>>
    %37 = vector.broadcast %36 : f32 to vector<8x1xf32>
    %38 = arith.addf %35, %37 : vector<8x1xf32>
    %c0_24 = arith.constant 0 : index
    %c0_25 = arith.constant 0 : index
    %39 = vector.load %arg11[%c0_24, %c0_25] : memref<8x1xf32, #tpu.memory_space<vmem>>, vector<8x1xf32>
    tpu.vector_store %arg11[%c0_24, %c0_25], %38 {strides = array<i32>} : memref<8x1xf32, #tpu.memory_space<vmem>>, vector<8x1xf32>,
    return
  }
  func.func @transform_0(%arg0: i32) -> (i32, i32) {
    %c0_i32 = arith.constant 0 : i32
    %c0_i32_0 = arith.constant 0 : i32
    return %arg0, %c0_i32 : i32, i32
  }
  func.func @transform_1(%arg0: i32) -> (i32, i32) {
    %c0_i32 = arith.constant 0 : i32
    %c0_i32_0 = arith.constant 0 : i32
    return %arg0, %c0_i32 : i32, i32
  }
  func.func @transform_2(%arg0: i32) -> (i32, i32) {
    %c0_i32 = arith.constant 0 : i32
    %c0_i32_0 = arith.constant 0 : i32
    return %arg0, %c0_i32 : i32, i32
  }
  func.func @transform_3(%arg0: i32) -> (i32, i32) {
    %c0_i32 = arith.constant 0 : i32
    %c0_i32_0 = arith.constant 0 : i32
    %c0_i32_1 = arith.constant 0 : i32
    return %c0_i32, %c0_i32_0 : i32, i32
  }
  func.func @transform_4(%arg0: i32) -> (i32, i32) {
    %c0_i32 = arith.constant 0 : i32
    %c0_i32_0 = arith.constant 0 : i32
    %c0_i32_1 = arith.constant 0 : i32
    return %c0_i32, %c0_i32_0 : i32, i32
  }
  func.func @transform_5(%arg0: i32) -> (i32, i32) {
    %c0_i32 = arith.constant 0 : i32
    %c0_i32_0 = arith.constant 0 : i32
    %c0_i32_1 = arith.constant 0 : i32
    return %c0_i32, %c0_i32_0 : i32, i32
  }
  func.func @transform_6(%arg0: i32) -> (i32, i32) {
    %c0_i32 = arith.constant 0 : i32
    %c0_i32_0 = arith.constant 0 : i32
    %c0_i32_1 = arith.constant 0 : i32
    return %c0_i32, %c0_i32_0 : i32, i32
  }
  func.func @transform_7(%arg0: i32) -> (i32, i32) {
    %c0_i32 = arith.constant 0 : i32
    %c0_i32_0 = arith.constant 0 : i32
    %c0_i32_1 = arith.constant 0 : i32
    return %c0_i32, %c0_i32_0 : i32, i32
  }
  func.func @transform_8(%arg0: i32) -> (i32, i32) {
    %c0_i32 = arith.constant 0 : i32
    %c0_i32_0 = arith.constant 0 : i32
    %c0_i32_1 = arith.constant 0 : i32
    return %c0_i32, %c0_i32_0 : i32, i32
  }
  func.func @transform_9(%arg0: i32) -> i32 {
    %c0_i32 = arith.constant 0 : i32
    %c0_i32_0 = arith.constant 0 : i32
    return %c0_i32 : i32
  }
  func.func @transform_10(%arg0: i32) -> (i32, i32) {
    %c0_i32 = arith.constant 0 : i32
    %c0_i32_0 = arith.constant 0 : i32
    return %arg0, %c0_i32 : i32, i32
  }
}

</mosaic_0001>

<bundles_post_ra>
// kernel: tpu_custom_call.1
= control target key start
LH: loop header
LB: loop body
LE: loop exit
PB: predicated region body
PF: predicated region fallthrough
CT: control target
= control target key end

     0   :  { %vm63_vm0 = vcmask 1041408   ;;  %v535_v0 = vmov 0   ;;  %v536_v2 = vmov 0.0   ;;  %vm537_vm1 = vmmov 0   ;;  %s742_s0 = inlined_call_operand.vmem [shape: s32[8,1], index: 0, kind: input, shape index: {}]   ;;  %s743_s1 = inlined_call_operand.vmem [shape: s32[8,1], index: 1, kind: input, shape index: {}]   ;;  %s744_s3 = inlined_call_operand.vmem [shape: f32[50,32], index: 3, kind: input, shape index: {}]   ;;  %s745_s6 = inlined_call_operand.vmem [shape: f32[100,32], index: 6, kind: input, shape index: {}]   ;;  %s746_s2 = inlined_call_operand.vmem [shape: f32[8,100], index: 2, kind: input, shape index: {}]   ;;  %s747_s4 = inlined_call_operand.vmem [shape: f32[40,32], index: 4, kind: input, shape index: {}]   ;;  %s748_s5 = inlined_call_operand.vmem [shape: f32[32,32], index: 5, kind: input, shape index: {}]   ;;  %s749_s7 = inlined_call_operand.vmem [shape: f32[1,32], index: 7, kind: input, shape index: {}]   ;;  %s750_s8 = inlined_call_operand.vmem [shape: f32[1,32], index: 8, kind: input, shape index: {}]   ;;  %s751_s9 = inlined_call_operand.<no memory space> [shape: f32[1], index: 9, kind: input, shape index: {}]   ;;  %s752_s10 = inlined_call_operand.vmem [shape: f32[8,1], index: 10, kind: output, shape index: {}]  }
   0x1   :  { %534 = vset.pattern.permute.xlu0 %v535_v0  ;;  %v36_v1 = vld [vmem:[%s742_s0] sm:$0xff]  ;;  %461 = vmatprep.subr.mxu0 %v536_v2  ;;  %v58_v3 = vld [vmem:[%s744_s3 + $0x30] sm:$0x3]  ;;  %v57_v4 = vld [vmem:[%s744_s3 + $0x28] sm:$0xff]  ;;  %vm238_vm2 = vcmask 1043456   ;;  %vm234_vm3 = vcmask 818176   ;;  %v38_v25 = vlaneseq  ;;  %v410_v57 = vstv %s751_s9 }
   0x2   :  { %41 = vperm.xlu0 %534, %v36_v1   ;;  %462 = vmatpush3.msk.msra.mxu0 %vm63_vm0, %v58_v3  ;;  %v37_v5 = vld [vmem:[%s743_s1] sm:$0xff]  ;;  %v55_v7 = vld [vmem:[%s744_s3 + $0x18] sm:$0xff]  ;;  %v54_v8 = vld [vmem:[%s744_s3 + $0x10] sm:$0xff]  ;;  %vm59_vm4 = vcmask 408576   ;;  %vm142_vm7 = vcmask 326656   ;;  %vm312_vm8 = vcmask 261120  }
   0x3   :  { %463 = vmatprep.subr.mxu0 %v536_v2  ;;  %v56_v6 = vld [vmem:[%s744_s3 + $0x20] sm:$0xff]  ;;  %475 = vmatprep.mubr.msk.f32.mxu0 %vm537_vm1, %v536_v2  ;;  %v53_v9 = vld [vmem:[%s744_s3 + $0x8] sm:$0xff]  ;;  %v232_v12 = vld [vmem:[%s745_s6 + $0x58] sm:$0xff]  ;;  %v39_v26 = vand.u32 127, %v38_v25  ;;  %vm412_vm9 = vcmask 7168  }
   0x4   :  { %464 = vmatpush3.msra.mxu0 %v57_v4  ;;  %491 = vmatprep.subr.mxu1 %v536_v2  ;;  %v52_v10 = vld [vmem:[%s744_s3] sm:$0xff]  ;;  %v231_v13 = vld [vmem:[%s745_s6 + $0x50] sm:$0xff]  ;;  %v230_v14 = vld [vmem:[%s745_s6 + $0x48] sm:$0xff] }
   0x5   :  { %465 = vmatprep.subr.mxu0 %v536_v2  ;;  %517 = vmatprep.mubr.msk.f32.mxu1 %vm537_vm1, %v536_v2  ;;  %v233_v11 = vld [vmem:[%s745_s6 + $0x60] sm:$0xf]  ;;  %v228_v16 = vld [vmem:[%s745_s6 + $0x38] sm:$0xff]  ;;  %v227_v17 = vld [vmem:[%s745_s6 + $0x30] sm:$0xff] }
   0x6   :  { %47 = vperm.xlu0 %534, %v37_v5   ;;  %466 = vmatpush3.msra.mxu0 %v56_v6  ;;  %v229_v15 = vld [vmem:[%s745_s6 + $0x40] sm:$0xff]  ;;  %v226_v18 = vld [vmem:[%s745_s6 + $0x28] sm:$0xff]  ;;  %v224_v20 = vld [vmem:[%s745_s6 + $0x18] sm:$0xff] }
   0x7   :  { %467 = vmatprep.subr.mxu0 %v536_v2  ;;  %492 = vmatpush3.msk.msra.mxu1 %vm238_vm2, %v233_v11  ;;  %v225_v19 = vld [vmem:[%s745_s6 + $0x20] sm:$0xff]  ;;  %v223_v21 = vld [vmem:[%s745_s6 + $0x10] sm:$0xff]  ;;  %v222_v22 = vld [vmem:[%s745_s6 + $0x8] sm:$0xff] }
   0x8   :  { %468 = vmatpush3.msra.mxu0 %v55_v7  ;;  %493 = vmatprep.subr.mxu1 %v536_v2  ;;  %v221_v23 = vld [vmem:[%s745_s6] sm:$0xff]  ;;  %v140_v30 = vld [vmem:[%s747_s4 + $0x18] sm:$0xff]  ;;  %v139_v31 = vld [vmem:[%s747_s4 + $0x10] sm:$0xff] }
   0x9   :  { %469 = vmatprep.subr.mxu0 %v536_v2  ;;  %494 = vmatpush3.msra.mxu1 %v232_v12  ;;  %v216_v24 = vld [vmem:[%s746_s2] sm:$0xff]  ;;  %v138_v33 = vld [vmem:[%s747_s4 + $0x8] sm:$0xff]  ;;  %v220_v35 = vld [vmem:[%s748_s5 + $0x18] sm:$0xff] }
   0xa   :  { %470 = vmatpush3.msra.mxu0 %v54_v8  ;;  %495 = vmatprep.subr.mxu1 %v536_v2  ;;  %v141_v28 = vld [vmem:[%s747_s4 + $0x20] sm:$0xff]  ;;  %v219_v37 = vld [vmem:[%s748_s5 + $0x10] sm:$0xff]  ;;  %v218_v38 = vld [vmem:[%s748_s5 + $0x8] sm:$0xff] }
   0xb   :  { %471 = vmatprep.subr.mxu0 %v536_v2  ;;  %496 = vmatpush3.msra.mxu1 %v231_v13  ;;  %v137_v34 = vld [vmem:[%s747_s4] sm:$0xff] }
   0xc   :  { %472 = vmatpush3.msra.mxu0 %v53_v9  ;;  %497 = vmatprep.subr.mxu1 %v536_v2  ;;  %v217_v39 = vld [vmem:[%s748_s5] sm:$0xff] }
   0xd   :  { %473 = vmatprep.subr.mxu0 %v536_v2  ;;  %498 = vmatpush3.msra.mxu1 %v230_v14  ;;  %v426_v48 = vld [vmem:[%s749_s7] ss:$0 sm:$0xff] }
   0xe   :  { %474 = vmatpush3.msra.mxu0 %v52_v10  ;;  %499 = vmatprep.subr.mxu1 %v536_v2  ;;  %v427_v52 = vld [vmem:[%s750_s8] ss:$0 sm:$0xff] }
   0xf   :  { %478 = vmatprep.subr.mxu0 %v536_v2  ;;  %500 = vmatpush3.msra.mxu1 %v229_v15 }
  0x10   :  { %501 = vmatprep.subr.mxu1 %v536_v2 }
  0x11   :  { %502 = vmatpush3.msra.mxu1 %v228_v16 }
  0x12   :  { %503 = vmatprep.subr.mxu1 %v536_v2 }
  0x13   :  { %504 = vmatpush3.msra.mxu1 %v227_v17 }
  0x14   :  { %505 = vmatprep.subr.mxu1 %v536_v2 }
  0x15   :  { %506 = vmatpush3.msra.mxu1 %v226_v18 }
  0x16   :  { %507 = vmatprep.subr.mxu1 %v536_v2 }
  0x17   :  { %508 = vmatpush3.msra.mxu1 %v225_v19 }
  0x18   :  { %509 = vmatprep.subr.mxu1 %v536_v2 }
  0x19   :  { %510 = vmatpush3.msra.mxu1 %v224_v20 }
  0x1a   :  { %511 = vmatprep.subr.mxu1 %v536_v2 }
  0x1b   :  { %512 = vmatpush3.msra.mxu1 %v223_v21 }
  0x1c   :  { %513 = vmatprep.subr.mxu1 %v536_v2 }
  0x1d   :  { %514 = vmatpush3.msra.mxu1 %v222_v22 }
  0x1e   :  { %515 = vmatprep.subr.mxu1 %v536_v2 }
  0x1f   :  { %516 = vmatpush3.msra.mxu1 %v221_v23 }
  0x20   :  { %518 = vmatmul.mubr.msk.f32.vlgmr.msra.gmra.mxu1 %vm234_vm3, %v216_v24 }
  0x7d   :  { %v42_v27 = vpop.permute.xlu0 %41 }
  0x7e   :  { %vm43_vm5 = vcmp.eq.s32.totalorder %v39_v26, %v42_v27 }
  0x7f   :  { %v418_v29 = vsel %vm43_vm5, 1.0, %v536_v2 }
  0x80   :  { %476 = vmatmul.mubr.msk.f32.vlgmr.msra.gmra.mxu0 %vm59_vm4, %v418_v29 }
  0x81   :  { %479 = vmatpush3.msra.mxu0 %v141_v28  ;;  %488 = vmatprep.mubr.msk.f32.mxu0 %vm537_vm1, %v536_v2  ;;  %v48_v32 = vpop.permute.xlu0 %47 }
  0x82   :  { %480 = vmatprep.subr.mxu0 %v536_v2  ;;  %vm49_vm6 = vcmp.eq.s32.totalorder %v39_v26, %v48_v32 }
  0x83   :  { %481 = vmatpush3.msra.mxu0 %v140_v30  ;;  %v419_v36 = vsel %vm49_vm6, 1.0, %v536_v2 }
  0x84   :  { %482 = vmatprep.subr.mxu0 %v536_v2 }
  0x85   :  { %483 = vmatpush3.msra.mxu0 %v139_v31 }
  0x86   :  { %484 = vmatprep.subr.mxu0 %v536_v2 }
  0x87   :  { %485 = vmatpush3.msra.mxu0 %v138_v33 }
  0x88   :  { %486 = vmatprep.subr.mxu0 %v536_v2 }
  0x89   :  { %487 = vmatpush3.msra.mxu0 %v137_v34 }
  0x8a   :  { %489 = vmatmul.mubr.msk.f32.vlgmr.msra.gmra.mxu0 %vm142_vm7, %v419_v36  ;;  %520 = vmatprep.subr.mxu0 %v536_v2 }
  0x8b   :  { %521 = vmatpush3.msra.mxu0 %v220_v35  ;;  %528 = vmatprep.mubr.msk.f32.mxu0 %vm537_vm1, %v536_v2 }
  0x8c   :  { %522 = vmatprep.subr.mxu0 %v536_v2 }
  0x8d   :  { %523 = vmatpush3.msra.mxu0 %v219_v37 }
  0x8e   :  { %524 = vmatprep.subr.mxu0 %v536_v2 }
  0x8f   :  { %525 = vmatpush3.msra.mxu0 %v218_v38 }
  0x90   :  { %526 = vmatprep.subr.mxu0 %v536_v2 }
  0x91   :  { %527 = vmatpush3.msra.mxu0 %v217_v39 }
  0xe0   :  { %v308_v40 = vpop.f32.mrf.mxu1 }
  0xe2   :  { %v519_v41 = vpop.f32.mrf.mxu1 }
 0x140   :  { %v133_v42 = vpop.f32.mrf.mxu0 }
 0x141   :  { %529 = vmatmul.mubr.msk.f32.vlgmr.msra.gmra.mxu0 %vm312_vm8, %v133_v42 }
 0x142   :  { %v477_v43 = vpop.f32.mrf.mxu0 }
 0x14a   :  { %v212_v44 = vpop.f32.mrf.mxu0 }
 0x14b   :  { %v395_v45 = vmul.f32 %v212_v44, %v133_v42 }
 0x14c   :  { %v490_v46 = vpop.f32.mrf.mxu0 }
 0x201   :  { %v382_v47 = vpop.f32.mrf.mxu0 }
 0x202   :  { %v383_v49 = vadd.f32 %v382_v47, %v308_v40 }
 0x203   :  { %v530_v50 = vpop.f32.mrf.mxu0 }
 0x204   :  { %v393_v51 = vadd.f32 %v426_v48, %v383_v49 }
 0x206   :  { %v394_v53 = vmax.f32 %v393_v51, 0.0 }
 0x208   :  { %v403_v54 = vmul.f32 %v427_v52, %v394_v53 }
 0x20a   :  { %v404_v55 = vadd.f32 %v403_v54, %v395_v45 }
 0x20c   :  { %v405_v56 = vsel %vm312_vm8, %v404_v55, 0.0 }
 0x20d   :  { %406 = vadd.xlane.f32.xlu1 %v405_v56 }
 0x296   :  { %v407_v58 = vpop.xlane.xlu1 %406 }
 0x297   :  { %v408_v59 = vmul.f32 0.5, %v407_v58 }
 0x299   :  { %v411_v60 = vadd.f32 %v410_v57, %v408_v59 }
 0x29b   :  { %413 = vst.msk [vmem:[%s752_s10] sm:$0xff] %vm412_vm9, %v411_v60 }

</bundles_post_ra>
